<compile_context>
chip_gen: v6e
topology: v6e:2x2x1
jax: 0.10.0
libtpu: 0.0.40
codegen_flags: <defaults>
</compile_context>

<pallas_src>
import jax
import jax.numpy as jnp
import numpy as np
from jax.experimental import pallas as pl
from jax.experimental.pallas import tpu as pltpu


def _interp_matrix_align_corners(n_in: int, n_out: int) -> np.ndarray:
    """Row-stochastic (n_out, n_in) matrix implementing 1-D linear resize,
    matching torch.nn.Upsample(mode='bilinear', align_corners=True)."""
    if n_out <= 1 or n_in <= 1:
        scale = 0.0
    else:
        scale = (n_in - 1) / (n_out - 1)
    A = np.zeros((n_out, n_in), dtype=np.float32)
    for i in range(n_out):
        src = i * scale
        lo = min(int(np.floor(src)), n_in - 1)
        hi = min(lo + 1, n_in - 1)
        frac = np.float32(src - lo)
        A[i, lo] += np.float32(1.0) - frac
        A[i, hi] += frac
    return A


def _upblock_kernel(x_ref, w_ref, b_ref, awt_ref, ah_ref, o_ref, y_scr):
    # x_ref  : (1, Cin, H, W)      VMEM -- one batch element, NCHW layout
    # w_ref  : (Cout, Cin)         SMEM -- 1x1 conv weight (torch layout, 1x1 squeezed)
    # b_ref  : (Cout,)             SMEM -- conv bias
    # awt_ref: (W, 2W)             VMEM -- width interpolation matrix, transposed
    # ah_ref : (2H, H)             VMEM -- height interpolation matrix
    # o_ref  : (1, Cout, 2H, 2W)   VMEM -- NCHW output block
    # y_scr  : (Cout*H, W)         VMEM scratch -- conv output, channels stacked on sublanes
    cin = x_ref.shape[1]
    H, W = x_ref.shape[2], x_ref.shape[3]
    cout = o_ref.shape[1]

    awt = awt_ref[...]            # (W, 2W)   grid-invariant, tiny
    ah = ah_ref[...]              # (2H, H)   grid-invariant, tiny

    # Load each input-channel slab exactly once (Cin is small).
    xs = [x_ref[0, i] for i in range(cin)]              # Cin x (H, W)

    # 1x1 conv: unrolled scalar*slab VPU FMAs, scalars from SMEM.
    # Stack the Cout results along the sublane axis -> (Cout*H, W).
    for o in range(cout):                                # static unroll (Cout small)
        acc = xs[0] * w_ref[o, 0]
        for i in range(1, cin):                          # static unroll (Cin small)
            acc = acc + xs[i] * w_ref[o, i]
        y_scr[pl.ds(o * H, H), :] = acc + b_ref[o]       # (H, W) slab, aligned offset

    # Width interpolation for ALL channels in one MXU matmul (M = Cout*H).
    t = jnp.dot(y_scr[...], awt, preferred_element_type=jnp.float32)   # (Cout*H, 2W)

    # Height interpolation per channel (contraction dim H is per-channel).
    for o in range(cout):
        up = jnp.dot(ah, t[o * H:(o + 1) * H, :],
                     preferred_element_type=jnp.float32)               # (2H, 2W)
        o_ref[0, o] = up.astype(o_ref.dtype)


def upblock_forward(x_nchw, w_oi, bias):
    """x_nchw: (N, Cin, H, W) f32.  w_oi: (Cout, Cin) (torch Conv2d 1x1 weight squeezed).
    bias: (Cout,).  Returns (N, Cout, 2H, 2W), matching PyTorch UpBlock.forward."""
    N, Cin, H, W = x_nchw.shape
    Cout = w_oi.shape[0]
    Ho, Wo = 2 * H, 2 * W

    # Tiny host-side constants (4*(H^2 + W^2) floats total).
    Ah = jnp.asarray(_interp_matrix_align_corners(H, Ho))          # (Ho, H)
    AwT = jnp.asarray(_interp_matrix_align_corners(W, Wo).T)       # (W, Wo)

    return pl.pallas_call(
        _upblock_kernel,
        out_shape=jax.ShapeDtypeStruct((N, Cout, Ho, Wo), jnp.float32),
        grid_spec=pltpu.PrefetchScalarGridSpec(
            num_scalar_prefetch=0,
            grid=(N,),
            in_specs=[
                pl.BlockSpec((1, Cin, H, W), lambda n: (n, 0, 0, 0)),
                pl.BlockSpec(memory_space=pltpu.MemorySpace.SMEM),   # conv weight scalars
                pl.BlockSpec(memory_space=pltpu.MemorySpace.SMEM),   # conv bias scalars
                pl.BlockSpec((W, Wo), lambda n: (0, 0)),             # grid-invariant AwT
                pl.BlockSpec((Ho, H), lambda n: (0, 0)),             # grid-invariant Ah
            ],
            out_specs=pl.BlockSpec((1, Cout, Ho, Wo), lambda n: (n, 0, 0, 0)),
            scratch_shapes=[pltpu.VMEM((Cout * H, W), jnp.float32)],
        ),
        compiler_params=pltpu.CompilerParams(
            dimension_semantics=("parallel",)),    # megacore on v7x (N >= 2)
    )(x_nchw,
      jnp.asarray(w_oi, jnp.float32),
      jnp.asarray(bias, jnp.float32),
      AwT,
      Ah)


def upblock_reference(x_nchw, w_oi, bias):
    """Pure-JAX reference: 1x1 conv + separable bilinear upsample (align_corners=True)."""
    N, Cin, H, W = x_nchw.shape
    y = jnp.einsum("nihw,oi->nohw", x_nchw, w_oi) + bias[None, :, None, None]
    Ah = jnp.asarray(_interp_matrix_align_corners(H, 2 * H))
    Aw = jnp.asarray(_interp_matrix_align_corners(W, 2 * W))
    return jnp.einsum("Ih,nohw,Jw->noIJ", Ah, y, Aw)


if __name__ == "__main__":
    key = jax.random.PRNGKey(0)
    kx, kw, kb = jax.random.split(key, 3)

    N, Cin, Cout, H, W = 2, 4, 8, 16, 16
    x = jax.random.normal(kx, (N, Cin, H, W), dtype=jnp.float32)
    # torch Conv2d weight is (Cout, Cin, 1, 1); we use the squeezed (Cout, Cin) form.
    w = 0.1 * jax.random.normal(kw, (Cout, Cin), dtype=jnp.float32)
    b = 0.1 * jax.random.normal(kb, (Cout,), dtype=jnp.float32)

    out = jax.block_until_ready(upblock_forward(x, w, b))
    ref = jax.block_until_ready(upblock_reference(x, w, b))

    assert out.shape == (N, Cout, 2 * H, 2 * W), out.shape
    np.testing.assert_allclose(np.asarray(out), np.asarray(ref), rtol=1e-4, atol=1e-4)

    print("KERNEL_OK")
</pallas_src>

<mosaic_0001>
module attributes {stable_mosaic.version = 11 : i64} {
  func.func @_upblock_kernel(%arg0: i32, %arg1: memref<1x4x16x16xf32, #tpu.memory_space<vmem>>, %arg2: memref<8x4xf32, #tpu.memory_space<smem>>, %arg3: memref<8xf32, #tpu.memory_space<smem>>, %arg4: memref<16x32xf32, #tpu.memory_space<vmem>>, %arg5: memref<32x16xf32, #tpu.memory_space<vmem>>, %arg6: memref<1x8x32x32xf32, #tpu.memory_space<vmem>>, %arg7: memref<128x16xf32, #tpu.memory_space<vmem>>) attributes {dimension_semantics = [#tpu.dimension_semantics<parallel>], iteration_bounds = array<i64: 2>, scalar_prefetch = 0 : i64, scratch_operands = 1 : i64, tpu.core_type = #tpu.core_type<tc>, window_params = [{transform_indices = @transform_0, window_bounds = array<i64: 1, 4, 16, 16>}, {transform_indices = @transform_1, window_bounds = array<i64: 8, 4>}, {transform_indices = @transform_2, window_bounds = array<i64: 8>}, {pipeline_mode = #tpu.pipeline_mode<synchronous>, transform_indices = @transform_3, window_bounds = array<i64: 16, 32>}, {pipeline_mode = #tpu.pipeline_mode<synchronous>, transform_indices = @transform_4, window_bounds = array<i64: 32, 16>}, {transform_indices = @transform_5, window_bounds = array<i64: 1, 8, 32, 32>}]} {
    %c0 = arith.constant 0 : index
    %c0_0 = arith.constant 0 : index
    %0 = vector.load %arg4[%c0, %c0_0] : memref<16x32xf32, #tpu.memory_space<vmem>>, vector<16x32xf32>
    %c0_1 = arith.constant 0 : index
    %c0_2 = arith.constant 0 : index
    %1 = vector.load %arg5[%c0_1, %c0_2] : memref<32x16xf32, #tpu.memory_space<vmem>>, vector<32x16xf32>
    %c0_3 = arith.constant 0 : index
    %c0_4 = arith.constant 0 : index
    %c0_5 = arith.constant 0 : index
    %c0_6 = arith.constant 0 : index
    %2 = vector.load %arg1[%c0_3, %c0_4, %c0_5, %c0_6] : memref<1x4x16x16xf32, #tpu.memory_space<vmem>>, vector<1x1x16x16xf32>
    %3 = vector.shape_cast %2 : vector<1x1x16x16xf32> to vector<16x16xf32>
    %c0_7 = arith.constant 0 : index
    %c1 = arith.constant 1 : index
    %c0_8 = arith.constant 0 : index
    %c0_9 = arith.constant 0 : index
    %4 = vector.load %arg1[%c0_7, %c1, %c0_8, %c0_9] : memref<1x4x16x16xf32, #tpu.memory_space<vmem>>, vector<1x1x16x16xf32>
    %5 = vector.shape_cast %4 : vector<1x1x16x16xf32> to vector<16x16xf32>
    %c0_10 = arith.constant 0 : index
    %c2 = arith.constant 2 : index
    %c0_11 = arith.constant 0 : index
    %c0_12 = arith.constant 0 : index
    %6 = vector.load %arg1[%c0_10, %c2, %c0_11, %c0_12] : memref<1x4x16x16xf32, #tpu.memory_space<vmem>>, vector<1x1x16x16xf32>
    %7 = vector.shape_cast %6 : vector<1x1x16x16xf32> to vector<16x16xf32>
    %c0_13 = arith.constant 0 : index
    %c3 = arith.constant 3 : index
    %c0_14 = arith.constant 0 : index
    %c0_15 = arith.constant 0 : index
    %8 = vector.load %arg1[%c0_13, %c3, %c0_14, %c0_15] : memref<1x4x16x16xf32, #tpu.memory_space<vmem>>, vector<1x1x16x16xf32>
    %9 = vector.shape_cast %8 : vector<1x1x16x16xf32> to vector<16x16xf32>
    %c0_16 = arith.constant 0 : index
    %c0_17 = arith.constant 0 : index
    %10 = memref.load %arg2[%c0_16, %c0_17] : memref<8x4xf32, #tpu.memory_space<smem>>
    %11 = vector.broadcast %10 : f32 to vector<16x16xf32>
    %12 = arith.mulf %3, %11 : vector<16x16xf32>
    %c0_18 = arith.constant 0 : index
    %c1_19 = arith.constant 1 : index
    %13 = memref.load %arg2[%c0_18, %c1_19] : memref<8x4xf32, #tpu.memory_space<smem>>
    %14 = vector.broadcast %13 : f32 to vector<16x16xf32>
    %15 = arith.mulf %5, %14 : vector<16x16xf32>
    %16 = arith.addf %12, %15 : vector<16x16xf32>
    %c0_20 = arith.constant 0 : index
    %c2_21 = arith.constant 2 : index
    %17 = memref.load %arg2[%c0_20, %c2_21] : memref<8x4xf32, #tpu.memory_space<smem>>
    %18 = vector.broadcast %17 : f32 to vector<16x16xf32>
    %19 = arith.mulf %7, %18 : vector<16x16xf32>
    %20 = arith.addf %16, %19 : vector<16x16xf32>
    %c0_22 = arith.constant 0 : index
    %c3_23 = arith.constant 3 : index
    %21 = memref.load %arg2[%c0_22, %c3_23] : memref<8x4xf32, #tpu.memory_space<smem>>
    %22 = vector.broadcast %21 : f32 to vector<16x16xf32>
    %23 = arith.mulf %9, %22 : vector<16x16xf32>
    %24 = arith.addf %20, %23 : vector<16x16xf32>
    %c0_24 = arith.constant 0 : index
    %25 = memref.load %arg3[%c0_24] : memref<8xf32, #tpu.memory_space<smem>>
    %26 = vector.broadcast %25 : f32 to vector<16x16xf32>
    %27 = arith.addf %24, %26 : vector<16x16xf32>
    %c0_25 = arith.constant 0 : index
    %c0_26 = arith.constant 0 : index
    %28 = vector.load %arg7[%c0_25, %c0_26] : memref<128x16xf32, #tpu.memory_space<vmem>>, vector<16x16xf32>
    tpu.vector_store %arg7[%c0_25, %c0_26], %27 {strides = array<i32>} : memref<128x16xf32, #tpu.memory_space<vmem>>, vector<16x16xf32>,
    %c1_27 = arith.constant 1 : index
    %c0_28 = arith.constant 0 : index
    %29 = memref.load %arg2[%c1_27, %c0_28] : memref<8x4xf32, #tpu.memory_space<smem>>
    %30 = vector.broadcast %29 : f32 to vector<16x16xf32>
    %31 = arith.mulf %3, %30 : vector<16x16xf32>
    %c1_29 = arith.constant 1 : index
    %c1_30 = arith.constant 1 : index
    %32 = memref.load %arg2[%c1_29, %c1_30] : memref<8x4xf32, #tpu.memory_space<smem>>
    %33 = vector.broadcast %32 : f32 to vector<16x16xf32>
    %34 = arith.mulf %5, %33 : vector<16x16xf32>
    %35 = arith.addf %31, %34 : vector<16x16xf32>
    %c1_31 = arith.constant 1 : index
    %c2_32 = arith.constant 2 : index
    %36 = memref.load %arg2[%c1_31, %c2_32] : memref<8x4xf32, #tpu.memory_space<smem>>
    %37 = vector.broadcast %36 : f32 to vector<16x16xf32>
    %38 = arith.mulf %7, %37 : vector<16x16xf32>
    %39 = arith.addf %35, %38 : vector<16x16xf32>
    %c1_33 = arith.constant 1 : index
    %c3_34 = arith.constant 3 : index
    %40 = memref.load %arg2[%c1_33, %c3_34] : memref<8x4xf32, #tpu.memory_space<smem>>
    %41 = vector.broadcast %40 : f32 to vector<16x16xf32>
    %42 = arith.mulf %9, %41 : vector<16x16xf32>
    %43 = arith.addf %39, %42 : vector<16x16xf32>
    %c1_35 = arith.constant 1 : index
    %44 = memref.load %arg3[%c1_35] : memref<8xf32, #tpu.memory_space<smem>>
    %45 = vector.broadcast %44 : f32 to vector<16x16xf32>
    %46 = arith.addf %43, %45 : vector<16x16xf32>
    %c16 = arith.constant 16 : index
    %c0_36 = arith.constant 0 : index
    %47 = vector.load %arg7[%c16, %c0_36] : memref<128x16xf32, #tpu.memory_space<vmem>>, vector<16x16xf32>
    tpu.vector_store %arg7[%c16, %c0_36], %46 {strides = array<i32>} : memref<128x16xf32, #tpu.memory_space<vmem>>, vector<16x16xf32>,
    %c2_37 = arith.constant 2 : index
    %c0_38 = arith.constant 0 : index
    %48 = memref.load %arg2[%c2_37, %c0_38] : memref<8x4xf32, #tpu.memory_space<smem>>
    %49 = vector.broadcast %48 : f32 to vector<16x16xf32>
    %50 = arith.mulf %3, %49 : vector<16x16xf32>
    %c2_39 = arith.constant 2 : index
    %c1_40 = arith.constant 1 : index
    %51 = memref.load %arg2[%c2_39, %c1_40] : memref<8x4xf32, #tpu.memory_space<smem>>
    %52 = vector.broadcast %51 : f32 to vector<16x16xf32>
    %53 = arith.mulf %5, %52 : vector<16x16xf32>
    %54 = arith.addf %50, %53 : vector<16x16xf32>
    %c2_41 = arith.constant 2 : index
    %c2_42 = arith.constant 2 : index
    %55 = memref.load %arg2[%c2_41, %c2_42] : memref<8x4xf32, #tpu.memory_space<smem>>
    %56 = vector.broadcast %55 : f32 to vector<16x16xf32>
    %57 = arith.mulf %7, %56 : vector<16x16xf32>
    %58 = arith.addf %54, %57 : vector<16x16xf32>
    %c2_43 = arith.constant 2 : index
    %c3_44 = arith.constant 3 : index
    %59 = memref.load %arg2[%c2_43, %c3_44] : memref<8x4xf32, #tpu.memory_space<smem>>
    %60 = vector.broadcast %59 : f32 to vector<16x16xf32>
    %61 = arith.mulf %9, %60 : vector<16x16xf32>
    %62 = arith.addf %58, %61 : vector<16x16xf32>
    %c2_45 = arith.constant 2 : index
    %63 = memref.load %arg3[%c2_45] : memref<8xf32, #tpu.memory_space<smem>>
    %64 = vector.broadcast %63 : f32 to vector<16x16xf32>
    %65 = arith.addf %62, %64 : vector<16x16xf32>
    %c32 = arith.constant 32 : index
    %c0_46 = arith.constant 0 : index
    %66 = vector.load %arg7[%c32, %c0_46] : memref<128x16xf32, #tpu.memory_space<vmem>>, vector<16x16xf32>
    tpu.vector_store %arg7[%c32, %c0_46], %65 {strides = array<i32>} : memref<128x16xf32, #tpu.memory_space<vmem>>, vector<16x16xf32>,
    %c3_47 = arith.constant 3 : index
    %c0_48 = arith.constant 0 : index
    %67 = memref.load %arg2[%c3_47, %c0_48] : memref<8x4xf32, #tpu.memory_space<smem>>
    %68 = vector.broadcast %67 : f32 to vector<16x16xf32>
    %69 = arith.mulf %3, %68 : vector<16x16xf32>
    %c3_49 = arith.constant 3 : index
    %c1_50 = arith.constant 1 : index
    %70 = memref.load %arg2[%c3_49, %c1_50] : memref<8x4xf32, #tpu.memory_space<smem>>
    %71 = vector.broadcast %70 : f32 to vector<16x16xf32>
    %72 = arith.mulf %5, %71 : vector<16x16xf32>
    %73 = arith.addf %69, %72 : vector<16x16xf32>
    %c3_51 = arith.constant 3 : index
    %c2_52 = arith.constant 2 : index
    %74 = memref.load %arg2[%c3_51, %c2_52] : memref<8x4xf32, #tpu.memory_space<smem>>
    %75 = vector.broadcast %74 : f32 to vector<16x16xf32>
    %76 = arith.mulf %7, %75 : vector<16x16xf32>
    %77 = arith.addf %73, %76 : vector<16x16xf32>
    %c3_53 = arith.constant 3 : index
    %c3_54 = arith.constant 3 : index
    %78 = memref.load %arg2[%c3_53, %c3_54] : memref<8x4xf32, #tpu.memory_space<smem>>
    %79 = vector.broadcast %78 : f32 to vector<16x16xf32>
    %80 = arith.mulf %9, %79 : vector<16x16xf32>
    %81 = arith.addf %77, %80 : vector<16x16xf32>
    %c3_55 = arith.constant 3 : index
    %82 = memref.load %arg3[%c3_55] : memref<8xf32, #tpu.memory_space<smem>>
    %83 = vector.broadcast %82 : f32 to vector<16x16xf32>
    %84 = arith.addf %81, %83 : vector<16x16xf32>
    %c48 = arith.constant 48 : index
    %c0_56 = arith.constant 0 : index
    %85 = vector.load %arg7[%c48, %c0_56] : memref<128x16xf32, #tpu.memory_space<vmem>>, vector<16x16xf32>
    tpu.vector_store %arg7[%c48, %c0_56], %84 {strides = array<i32>} : memref<128x16xf32, #tpu.memory_space<vmem>>, vector<16x16xf32>,
    %c4 = arith.constant 4 : index
    %c0_57 = arith.constant 0 : index
    %86 = memref.load %arg2[%c4, %c0_57] : memref<8x4xf32, #tpu.memory_space<smem>>
    %87 = vector.broadcast %86 : f32 to vector<16x16xf32>
    %88 = arith.mulf %3, %87 : vector<16x16xf32>
    %c4_58 = arith.constant 4 : index
    %c1_59 = arith.constant 1 : index
    %89 = memref.load %arg2[%c4_58, %c1_59] : memref<8x4xf32, #tpu.memory_space<smem>>
    %90 = vector.broadcast %89 : f32 to vector<16x16xf32>
    %91 = arith.mulf %5, %90 : vector<16x16xf32>
    %92 = arith.addf %88, %91 : vector<16x16xf32>
    %c4_60 = arith.constant 4 : index
    %c2_61 = arith.constant 2 : index
    %93 = memref.load %arg2[%c4_60, %c2_61] : memref<8x4xf32, #tpu.memory_space<smem>>
    %94 = vector.broadcast %93 : f32 to vector<16x16xf32>
    %95 = arith.mulf %7, %94 : vector<16x16xf32>
    %96 = arith.addf %92, %95 : vector<16x16xf32>
    %c4_62 = arith.constant 4 : index
    %c3_63 = arith.constant 3 : index
    %97 = memref.load %arg2[%c4_62, %c3_63] : memref<8x4xf32, #tpu.memory_space<smem>>
    %98 = vector.broadcast %97 : f32 to vector<16x16xf32>
    %99 = arith.mulf %9, %98 : vector<16x16xf32>
    %100 = arith.addf %96, %99 : vector<16x16xf32>
    %c4_64 = arith.constant 4 : index
    %101 = memref.load %arg3[%c4_64] : memref<8xf32, #tpu.memory_space<smem>>
    %102 = vector.broadcast %101 : f32 to vector<16x16xf32>
    %103 = arith.addf %100, %102 : vector<16x16xf32>
    %c64 = arith.constant 64 : index
    %c0_65 = arith.constant 0 : index
    %104 = vector.load %arg7[%c64, %c0_65] : memref<128x16xf32, #tpu.memory_space<vmem>>, vector<16x16xf32>
    tpu.vector_store %arg7[%c64, %c0_65], %103 {strides = array<i32>} : memref<128x16xf32, #tpu.memory_space<vmem>>, vector<16x16xf32>,
    %c5 = arith.constant 5 : index
    %c0_66 = arith.constant 0 : index
    %105 = memref.load %arg2[%c5, %c0_66] : memref<8x4xf32, #tpu.memory_space<smem>>
    %106 = vector.broadcast %105 : f32 to vector<16x16xf32>
    %107 = arith.mulf %3, %106 : vector<16x16xf32>
    %c5_67 = arith.constant 5 : index
    %c1_68 = arith.constant 1 : index
    %108 = memref.load %arg2[%c5_67, %c1_68] : memref<8x4xf32, #tpu.memory_space<smem>>
    %109 = vector.broadcast %108 : f32 to vector<16x16xf32>
    %110 = arith.mulf %5, %109 : vector<16x16xf32>
    %111 = arith.addf %107, %110 : vector<16x16xf32>
    %c5_69 = arith.constant 5 : index
    %c2_70 = arith.constant 2 : index
    %112 = memref.load %arg2[%c5_69, %c2_70] : memref<8x4xf32, #tpu.memory_space<smem>>
    %113 = vector.broadcast %112 : f32 to vector<16x16xf32>
    %114 = arith.mulf %7, %113 : vector<16x16xf32>
    %115 = arith.addf %111, %114 : vector<16x16xf32>
    %c5_71 = arith.constant 5 : index
    %c3_72 = arith.constant 3 : index
    %116 = memref.load %arg2[%c5_71, %c3_72] : memref<8x4xf32, #tpu.memory_space<smem>>
    %117 = vector.broadcast %116 : f32 to vector<16x16xf32>
    %118 = arith.mulf %9, %117 : vector<16x16xf32>
    %119 = arith.addf %115, %118 : vector<16x16xf32>
    %c5_73 = arith.constant 5 : index
    %120 = memref.load %arg3[%c5_73] : memref<8xf32, #tpu.memory_space<smem>>
    %121 = vector.broadcast %120 : f32 to vector<16x16xf32>
    %122 = arith.addf %119, %121 : vector<16x16xf32>
    %c80 = arith.constant 80 : index
    %c0_74 = arith.constant 0 : index
    %123 = vector.load %arg7[%c80, %c0_74] : memref<128x16xf32, #tpu.memory_space<vmem>>, vector<16x16xf32>
    tpu.vector_store %arg7[%c80, %c0_74], %122 {strides = array<i32>} : memref<128x16xf32, #tpu.memory_space<vmem>>, vector<16x16xf32>,
    %c6 = arith.constant 6 : index
    %c0_75 = arith.constant 0 : index
    %124 = memref.load %arg2[%c6, %c0_75] : memref<8x4xf32, #tpu.memory_space<smem>>
    %125 = vector.broadcast %124 : f32 to vector<16x16xf32>
    %126 = arith.mulf %3, %125 : vector<16x16xf32>
    %c6_76 = arith.constant 6 : index
    %c1_77 = arith.constant 1 : index
    %127 = memref.load %arg2[%c6_76, %c1_77] : memref<8x4xf32, #tpu.memory_space<smem>>
    %128 = vector.broadcast %127 : f32 to vector<16x16xf32>
    %129 = arith.mulf %5, %128 : vector<16x16xf32>
    %130 = arith.addf %126, %129 : vector<16x16xf32>
    %c6_78 = arith.constant 6 : index
    %c2_79 = arith.constant 2 : index
    %131 = memref.load %arg2[%c6_78, %c2_79] : memref<8x4xf32, #tpu.memory_space<smem>>
    %132 = vector.broadcast %131 : f32 to vector<16x16xf32>
    %133 = arith.mulf %7, %132 : vector<16x16xf32>
    %134 = arith.addf %130, %133 : vector<16x16xf32>
    %c6_80 = arith.constant 6 : index
    %c3_81 = arith.constant 3 : index
    %135 = memref.load %arg2[%c6_80, %c3_81] : memref<8x4xf32, #tpu.memory_space<smem>>
    %136 = vector.broadcast %135 : f32 to vector<16x16xf32>
    %137 = arith.mulf %9, %136 : vector<16x16xf32>
    %138 = arith.addf %134, %137 : vector<16x16xf32>
    %c6_82 = arith.constant 6 : index
    %139 = memref.load %arg3[%c6_82] : memref<8xf32, #tpu.memory_space<smem>>
    %140 = vector.broadcast %139 : f32 to vector<16x16xf32>
    %141 = arith.addf %138, %140 : vector<16x16xf32>
    %c96 = arith.constant 96 : index
    %c0_83 = arith.constant 0 : index
    %142 = vector.load %arg7[%c96, %c0_83] : memref<128x16xf32, #tpu.memory_space<vmem>>, vector<16x16xf32>
    tpu.vector_store %arg7[%c96, %c0_83], %141 {strides = array<i32>} : memref<128x16xf32, #tpu.memory_space<vmem>>, vector<16x16xf32>,
    %c7 = arith.constant 7 : index
    %c0_84 = arith.constant 0 : index
    %143 = memref.load %arg2[%c7, %c0_84] : memref<8x4xf32, #tpu.memory_space<smem>>
    %144 = vector.broadcast %143 : f32 to vector<16x16xf32>
    %145 = arith.mulf %3, %144 : vector<16x16xf32>
    %c7_85 = arith.constant 7 : index
    %c1_86 = arith.constant 1 : index
    %146 = memref.load %arg2[%c7_85, %c1_86] : memref<8x4xf32, #tpu.memory_space<smem>>
    %147 = vector.broadcast %146 : f32 to vector<16x16xf32>
    %148 = arith.mulf %5, %147 : vector<16x16xf32>
    %149 = arith.addf %145, %148 : vector<16x16xf32>
    %c7_87 = arith.constant 7 : index
    %c2_88 = arith.constant 2 : index
    %150 = memref.load %arg2[%c7_87, %c2_88] : memref<8x4xf32, #tpu.memory_space<smem>>
    %151 = vector.broadcast %150 : f32 to vector<16x16xf32>
    %152 = arith.mulf %7, %151 : vector<16x16xf32>
    %153 = arith.addf %149, %152 : vector<16x16xf32>
    %c7_89 = arith.constant 7 : index
    %c3_90 = arith.constant 3 : index
    %154 = memref.load %arg2[%c7_89, %c3_90] : memref<8x4xf32, #tpu.memory_space<smem>>
    %155 = vector.broadcast %154 : f32 to vector<16x16xf32>
    %156 = arith.mulf %9, %155 : vector<16x16xf32>
    %157 = arith.addf %153, %156 : vector<16x16xf32>
    %c7_91 = arith.constant 7 : index
    %158 = memref.load %arg3[%c7_91] : memref<8xf32, #tpu.memory_space<smem>>
    %159 = vector.broadcast %158 : f32 to vector<16x16xf32>
    %160 = arith.addf %157, %159 : vector<16x16xf32>
    %c112 = arith.constant 112 : index
    %c0_92 = arith.constant 0 : index
    %161 = vector.load %arg7[%c112, %c0_92] : memref<128x16xf32, #tpu.memory_space<vmem>>, vector<16x16xf32>
    tpu.vector_store %arg7[%c112, %c0_92], %160 {strides = array<i32>} : memref<128x16xf32, #tpu.memory_space<vmem>>, vector<16x16xf32>,
    %c0_93 = arith.constant 0 : index
    %c0_94 = arith.constant 0 : index
    %162 = vector.load %arg7[%c0_93, %c0_94] : memref<128x16xf32, #tpu.memory_space<vmem>>, vector<128x16xf32>
    %cst = arith.constant dense<0.000000e+00> : vector<128x32xf32>
    %163 = tpu.matmul %162, %0, %cst {dimension_numbers = #tpu.dot_dimension_numbers<[1], [0], [0], [1], [0, 0, 1, 1], [], []>} : vector<128x16xf32>, vector<16x32xf32>, vector<128x32xf32> -> vector<128x32xf32>
    %164 = vector.extract_strided_slice %163 {offsets = [0, 0], sizes = [16, 32], strides = [1, 1]} : vector<128x32xf32> to vector<16x32xf32>
    %cst_95 = arith.constant dense<0.000000e+00> : vector<32x32xf32>
    %165 = tpu.matmul %1, %164, %cst_95 {dimension_numbers = #tpu.dot_dimension_numbers<[1], [0], [0], [1], [0, 0, 1, 1], [], []>} : vector<32x16xf32>, vector<16x32xf32>, vector<32x32xf32> -> vector<32x32xf32>
    %c0_96 = arith.constant 0 : index
    %c0_97 = arith.constant 0 : index
    %c0_98 = arith.constant 0 : index
    %c0_99 = arith.constant 0 : index
    %166 = vector.load %arg6[%c0_96, %c0_97, %c0_98, %c0_99] : memref<1x8x32x32xf32, #tpu.memory_space<vmem>>, vector<1x1x32x32xf32>
    %167 = vector.shape_cast %166 : vector<1x1x32x32xf32> to vector<32x32xf32>
    %168 = vector.shape_cast %165 : vector<32x32xf32> to vector<1x1x32x32xf32>
    tpu.vector_store %arg6[%c0_96, %c0_97, %c0_98, %c0_99], %168 {strides = array<i32>} : memref<1x8x32x32xf32, #tpu.memory_space<vmem>>, vector<1x1x32x32xf32>,
    %169 = vector.extract_strided_slice %163 {offsets = [16, 0], sizes = [16, 32], strides = [1, 1]} : vector<128x32xf32> to vector<16x32xf32>
    %cst_100 = arith.constant dense<0.000000e+00> : vector<32x32xf32>
    %170 = tpu.matmul %1, %169, %cst_100 {dimension_numbers = #tpu.dot_dimension_numbers<[1], [0], [0], [1], [0, 0, 1, 1], [], []>} : vector<32x16xf32>, vector<16x32xf32>, vector<32x32xf32> -> vector<32x32xf32>
    %c0_101 = arith.constant 0 : index
    %c1_102 = arith.constant 1 : index
    %c0_103 = arith.constant 0 : index
    %c0_104 = arith.constant 0 : index
    %171 = vector.load %arg6[%c0_101, %c1_102, %c0_103, %c0_104] : memref<1x8x32x32xf32, #tpu.memory_space<vmem>>, vector<1x1x32x32xf32>
    %172 = vector.shape_cast %171 : vector<1x1x32x32xf32> to vector<32x32xf32>
    %173 = vector.shape_cast %170 : vector<32x32xf32> to vector<1x1x32x32xf32>
    tpu.vector_store %arg6[%c0_101, %c1_102, %c0_103, %c0_104], %173 {strides = array<i32>} : memref<1x8x32x32xf32, #tpu.memory_space<vmem>>, vector<1x1x32x32xf32>,
    %174 = vector.extract_strided_slice %163 {offsets = [32, 0], sizes = [16, 32], strides = [1, 1]} : vector<128x32xf32> to vector<16x32xf32>
    %cst_105 = arith.constant dense<0.000000e+00> : vector<32x32xf32>
    %175 = tpu.matmul %1, %174, %cst_105 {dimension_numbers = #tpu.dot_dimension_numbers<[1], [0], [0], [1], [0, 0, 1, 1], [], []>} : vector<32x16xf32>, vector<16x32xf32>, vector<32x32xf32> -> vector<32x32xf32>
    %c0_106 = arith.constant 0 : index
    %c2_107 = arith.constant 2 : index
    %c0_108 = arith.constant 0 : index
    %c0_109 = arith.constant 0 : index
    %176 = vector.load %arg6[%c0_106, %c2_107, %c0_108, %c0_109] : memref<1x8x32x32xf32, #tpu.memory_space<vmem>>, vector<1x1x32x32xf32>
    %177 = vector.shape_cast %176 : vector<1x1x32x32xf32> to vector<32x32xf32>
    %178 = vector.shape_cast %175 : vector<32x32xf32> to vector<1x1x32x32xf32>
    tpu.vector_store %arg6[%c0_106, %c2_107, %c0_108, %c0_109], %178 {strides = array<i32>} : memref<1x8x32x32xf32, #tpu.memory_space<vmem>>, vector<1x1x32x32xf32>,
    %179 = vector.extract_strided_slice %163 {offsets = [48, 0], sizes = [16, 32], strides = [1, 1]} : vector<128x32xf32> to vector<16x32xf32>
    %cst_110 = arith.constant dense<0.000000e+00> : vector<32x32xf32>
    %180 = tpu.matmul %1, %179, %cst_110 {dimension_numbers = #tpu.dot_dimension_numbers<[1], [0], [0], [1], [0, 0, 1, 1], [], []>} : vector<32x16xf32>, vector<16x32xf32>, vector<32x32xf32> -> vector<32x32xf32>
    %c0_111 = arith.constant 0 : index
    %c3_112 = arith.constant 3 : index
    %c0_113 = arith.constant 0 : index
    %c0_114 = arith.constant 0 : index
    %181 = vector.load %arg6[%c0_111, %c3_112, %c0_113, %c0_114] : memref<1x8x32x32xf32, #tpu.memory_space<vmem>>, vector<1x1x32x32xf32>
    %182 = vector.shape_cast %181 : vector<1x1x32x32xf32> to vector<32x32xf32>
    %183 = vector.shape_cast %180 : vector<32x32xf32> to vector<1x1x32x32xf32>
    tpu.vector_store %arg6[%c0_111, %c3_112, %c0_113, %c0_114], %183 {strides = array<i32>} : memref<1x8x32x32xf32, #tpu.memory_space<vmem>>, vector<1x1x32x32xf32>,
    %184 = vector.extract_strided_slice %163 {offsets = [64, 0], sizes = [16, 32], strides = [1, 1]} : vector<128x32xf32> to vector<16x32xf32>
    %cst_115 = arith.constant dense<0.000000e+00> : vector<32x32xf32>
    %185 = tpu.matmul %1, %184, %cst_115 {dimension_numbers = #tpu.dot_dimension_numbers<[1], [0], [0], [1], [0, 0, 1, 1], [], []>} : vector<32x16xf32>, vector<16x32xf32>, vector<32x32xf32> -> vector<32x32xf32>
    %c0_116 = arith.constant 0 : index
    %c4_117 = arith.constant 4 : index
    %c0_118 = arith.constant 0 : index
    %c0_119 = arith.constant 0 : index
    %186 = vector.load %arg6[%c0_116, %c4_117, %c0_118, %c0_119] : memref<1x8x32x32xf32, #tpu.memory_space<vmem>>, vector<1x1x32x32xf32>
    %187 = vector.shape_cast %186 : vector<1x1x32x32xf32> to vector<32x32xf32>
    %188 = vector.shape_cast %185 : vector<32x32xf32> to vector<1x1x32x32xf32>
    tpu.vector_store %arg6[%c0_116, %c4_117, %c0_118, %c0_119], %188 {strides = array<i32>} : memref<1x8x32x32xf32, #tpu.memory_space<vmem>>, vector<1x1x32x32xf32>,
    %189 = vector.extract_strided_slice %163 {offsets = [80, 0], sizes = [16, 32], strides = [1, 1]} : vector<128x32xf32> to vector<16x32xf32>
    %cst_120 = arith.constant dense<0.000000e+00> : vector<32x32xf32>
    %190 = tpu.matmul %1, %189, %cst_120 {dimension_numbers = #tpu.dot_dimension_numbers<[1], [0], [0], [1], [0, 0, 1, 1], [], []>} : vector<32x16xf32>, vector<16x32xf32>, vector<32x32xf32> -> vector<32x32xf32>
    %c0_121 = arith.constant 0 : index
    %c5_122 = arith.constant 5 : index
    %c0_123 = arith.constant 0 : index
    %c0_124 = arith.constant 0 : index
    %191 = vector.load %arg6[%c0_121, %c5_122, %c0_123, %c0_124] : memref<1x8x32x32xf32, #tpu.memory_space<vmem>>, vector<1x1x32x32xf32>
    %192 = vector.shape_cast %191 : vector<1x1x32x32xf32> to vector<32x32xf32>
    %193 = vector.shape_cast %190 : vector<32x32xf32> to vector<1x1x32x32xf32>
    tpu.vector_store %arg6[%c0_121, %c5_122, %c0_123, %c0_124], %193 {strides = array<i32>} : memref<1x8x32x32xf32, #tpu.memory_space<vmem>>, vector<1x1x32x32xf32>,
    %194 = vector.extract_strided_slice %163 {offsets = [96, 0], sizes = [16, 32], strides = [1, 1]} : vector<128x32xf32> to vector<16x32xf32>
    %cst_125 = arith.constant dense<0.000000e+00> : vector<32x32xf32>
    %195 = tpu.matmul %1, %194, %cst_125 {dimension_numbers = #tpu.dot_dimension_numbers<[1], [0], [0], [1], [0, 0, 1, 1], [], []>} : vector<32x16xf32>, vector<16x32xf32>, vector<32x32xf32> -> vector<32x32xf32>
    %c0_126 = arith.constant 0 : index
    %c6_127 = arith.constant 6 : index
    %c0_128 = arith.constant 0 : index
    %c0_129 = arith.constant 0 : index
    %196 = vector.load %arg6[%c0_126, %c6_127, %c0_128, %c0_129] : memref<1x8x32x32xf32, #tpu.memory_space<vmem>>, vector<1x1x32x32xf32>
    %197 = vector.shape_cast %196 : vector<1x1x32x32xf32> to vector<32x32xf32>
    %198 = vector.shape_cast %195 : vector<32x32xf32> to vector<1x1x32x32xf32>
    tpu.vector_store %arg6[%c0_126, %c6_127, %c0_128, %c0_129], %198 {strides = array<i32>} : memref<1x8x32x32xf32, #tpu.memory_space<vmem>>, vector<1x1x32x32xf32>,
    %199 = vector.extract_strided_slice %163 {offsets = [112, 0], sizes = [16, 32], strides = [1, 1]} : vector<128x32xf32> to vector<16x32xf32>
    %cst_130 = arith.constant dense<0.000000e+00> : vector<32x32xf32>
    %200 = tpu.matmul %1, %199, %cst_130 {dimension_numbers = #tpu.dot_dimension_numbers<[1], [0], [0], [1], [0, 0, 1, 1], [], []>} : vector<32x16xf32>, vector<16x32xf32>, vector<32x32xf32> -> vector<32x32xf32>
    %c0_131 = arith.constant 0 : index
    %c7_132 = arith.constant 7 : index
    %c0_133 = arith.constant 0 : index
    %c0_134 = arith.constant 0 : index
    %201 = vector.load %arg6[%c0_131, %c7_132, %c0_133, %c0_134] : memref<1x8x32x32xf32, #tpu.memory_space<vmem>>, vector<1x1x32x32xf32>
    %202 = vector.shape_cast %201 : vector<1x1x32x32xf32> to vector<32x32xf32>
    %203 = vector.shape_cast %200 : vector<32x32xf32> to vector<1x1x32x32xf32>
    tpu.vector_store %arg6[%c0_131, %c7_132, %c0_133, %c0_134], %203 {strides = array<i32>} : memref<1x8x32x32xf32, #tpu.memory_space<vmem>>, vector<1x1x32x32xf32>,
    return
  }
  func.func @transform_0(%arg0: i32) -> (i32, i32, i32, i32) {
    %c0_i32 = arith.constant 0 : i32
    %c0_i32_0 = arith.constant 0 : i32
    %c0_i32_1 = arith.constant 0 : i32
    %c0_i32_2 = arith.constant 0 : i32
    return %arg0, %c0_i32, %c0_i32_0, %c0_i32_1 : i32, i32, i32, i32
  }
  func.func @transform_1(%arg0: i32) -> (i32, i32) {
    %c0_i32 = arith.constant 0 : i32
    %c0_i32_0 = arith.constant 0 : i32
    %c0_i32_1 = arith.constant 0 : i32
    return %c0_i32, %c0_i32_0 : i32, i32
  }
  func.func @transform_2(%arg0: i32) -> i32 {
    %c0_i32 = arith.constant 0 : i32
    %c0_i32_0 = arith.constant 0 : i32
    return %c0_i32 : i32
  }
  func.func @transform_3(%arg0: i32) -> (i32, i32) {
    %c0_i32 = arith.constant 0 : i32
    %c0_i32_0 = arith.constant 0 : i32
    %c0_i32_1 = arith.constant 0 : i32
    return %c0_i32, %c0_i32_0 : i32, i32
  }
  func.func @transform_4(%arg0: i32) -> (i32, i32) {
    %c0_i32 = arith.constant 0 : i32
    %c0_i32_0 = arith.constant 0 : i32
    %c0_i32_1 = arith.constant 0 : i32
    return %c0_i32, %c0_i32_0 : i32, i32
  }
  func.func @transform_5(%arg0: i32) -> (i32, i32, i32, i32) {
    %c0_i32 = arith.constant 0 : i32
    %c0_i32_0 = arith.constant 0 : i32
    %c0_i32_1 = arith.constant 0 : i32
    %c0_i32_2 = arith.constant 0 : i32
    return %arg0, %c0_i32, %c0_i32_0, %c0_i32_1 : i32, i32, i32, i32
  }
}

</mosaic_0001>

<bundles_post_ra>
// kernel: tpu_custom_call.1
= control target key start
LH: loop header
LB: loop body
LE: loop exit
PB: predicated region body
PF: predicated region fallthrough
CT: control target
= control target key end

     0   :  { %10 = vsyncpa [#allocation4], 0  ;;  %s2691_s0 = inlined_call_operand.hbm [shape: f32[2,4,16,16], index: 0, kind: input, shape index: {}]   ;;  %s2692_s1 = inlined_call_operand.vmem [shape: f32[8,4], index: 1, kind: input, shape index: {}]   ;;  %s2693_s2 = inlined_call_operand.vmem [shape: f32[8], index: 2, kind: input, shape index: {}]   ;;  %s2694_s3 = inlined_call_operand.vmem [shape: f32[16,32], index: 3, kind: input, shape index: {}]   ;;  %s2695_s4 = inlined_call_operand.vmem [shape: f32[32,16], index: 4, kind: input, shape index: {}]   ;;  %s2696_s5 = inlined_call_operand.hbm [shape: f32[2,8,32,32], index: 5, kind: output, shape index: {}]  }
   0x1   :  { %12 = vsyncpa [#allocation4 + $0x1], 0 }
   0x2   :  { %13 = vsyncpa [#allocation6], 0 }
   0x3   :  { %14 = vsyncpa [#allocation9], 0 }
   0x4   :  { %15 = vsyncpa [#allocation5], 0 }
   0x5   :  { %17 = vsyncpa [#allocation5 + $0x1], 0  ;;  %s2117_s18 = smov 0   ;;  %s2119_s19 = smov 0  }
   0x6   :  { %s2121_s20 = smov 0   ;;  %s2123_s21 = smov 0  }
   0x7 LB: > { %s2138_s22 = sadd.s32 4294967295, %s2077_s21   ;;  %s1562_s23 = sadd.s32 4294967294, %s2077_s21   ;;  %s2077_s21 = sphi %s2123_s21, %s2722_s21   ;;  %s2073_s20 = sphi %s2121_s20, %s2721_s20   ;;  %s2069_s19 = sphi %s2119_s19, %s2720_s19   ;;  %s2065_s18 = sphi %s2117_s18, %s2719_s18  }
   0x8   : > { %s2142_s24 = sadd.s32 1, %s2077_s21   ;;  %s30_s25 = sadd.s32 1, %s2073_s20 }
   0x9   : > { %s27_s26 = ssub.s32 %s2077_s21, %s2142_s24  ;;  %p37_p0 = scmp.ne.s32.totalorder %s2073_s20, %s2069_s19 }
   0xa   : > { %p28_p1 = scmp.eq.s32.totalorder %s27_s26, 0  ;;  %p38_p2 = scmp.eq.s32.totalorder %s2077_s21, 0 }
   0xb   : > { %p43_p3 = scmp.ne.s32.totalorder %s2069_s19, %s2065_s18  ;;  %p2697_p4 = scmp.eq.s32.totalorder %s2138_s22, 0 }
   0xc   : > { %s2154_s27 = scalar_select %p28_p1, %s2073_s20, %s30_s25  }
   0xd   : > { %p2156_p5 = por %p38_p2, %p37_p0  ;;  %p2162_p6 = por %p2697_p4, %p43_p3 }
   0xe   : > { %p151_p7 = scmp.eq.s32.totalorder %s2138_s22, 1  ;;  %p157_p8 = scmp.eq.s32.totalorder %s1562_s23, 1 }
   0xf   : > { %s2703_s29 = scalar_select %p2162_p6, 1, 0 }
  0x10   : > { %p1563_p9 = scmp.ge.s32.totalorder %s2077_s21, 1  ;;  %p164_p10 = scmp.lt.s32.totalorder %s2077_s21, 3 }
  0x11   : > { %p2169_p11 = por %p151_p7, %p37_p0  ;;  %p2173_p12 = por %p157_p8, %p43_p3 }
  0x12   : > { %p2177_p13 = pnand %p1563_p9, %p164_p10  ;;  %s177_s10 = sshll.u32 %s2692_s1, 4  ;;  %s178_s10 = int_to_ptr.vmem [resolvable:$true] %s177_s10 }
  0x13   : > { %s2704_s30 = scalar_select %p2169_p11, 1, 0 }
  0x14   : > { %s2705_s6 = scalar_select %p2173_p12, 1, 0 }
  0x15   : > { %s2706_s7 = scalar_select %p2177_p13, 1, 0 }
  0x16   : > { %p1888_p1 = pneg %p2177_p13  ;;  %p1905_p2 = scmp.lt.s32.totalorder %s2077_s21, 2 }
  0x17   : > { %s188_s14 = sshll.u32 %s2693_s2, 4  ;;  %s1947_s16 = scalar_lea.vmem %s178_s10, 128  ;;  %s189_s14 = int_to_ptr.vmem [resolvable:$true] %s188_s14 }
  0x18   : > { %p2190_p7 = pnand %p1888_p1, %p2697_p4  ;;  %p2199_p3 = pnand %p1905_p2, %p2156_p5 }
  0x19   : > { %p1948_p8 = scmp.ne.s32.totalorder %s178_s10, %s1947_s16  ;;  %p1955_p0 = scmp.lt.s32.totalorder %s178_s10, %s178_s10 }
  0x1a   : > { %s2708_s15 = scalar_select %p2199_p3, 1, 0 }
  0x1b   : > { %p1949_p9 = pneg %p2190_p7  ;;  %p1956_p4 = scmp.lt.s32.totalorder %s1947_s16, %s1947_s16 }
  0x1d   : > { %p1950_p10 = pnand %p1949_p9, %p1948_p8  ;;  %p1957_p12 = por %p1956_p4, %p1955_p0 }
  0x1f   : > { %p1951_p1 = pneg %p1950_p10 }
  0x21   : > { %p1958_p11 = pnand %p1957_p12, %p1951_p1 }
  0x23   : > { %1961 = shalt.err (!%p1958_p11)
}
  0x24   : > { %s2079_s17 = smov [#allocation7]   ;;  %s205_s23 = sand.u32 1, %s2073_s20  }
  0x25   : > { %1891 = dma.vmem_to_smem (!%p2190_p7), %s178_s10, 128, %s2079_s17, [#allocation6]  }
  0x26   : > { %s1962_s25 = scalar_lea.vmem %s189_s14, 16  ;;  %p1970_p8 = scmp.lt.s32.totalorder %s189_s14, %s189_s14 }
  0x27   : > { %p1963_p5 = scmp.ne.s32.totalorder %s189_s14, %s1962_s25  ;;  %p1971_p10 = scmp.lt.s32.totalorder %s1962_s25, %s1962_s25 }
  0x29   : > { %p1965_p2 = pnand %p1963_p5, %p1949_p9  ;;  %p1972_p13 = por %p1971_p10, %p1970_p8 }
  0x2b   : > { %p1966_p6 = pneg %p1965_p2 }
  0x2d   : > { %p1973_p3 = pnand %p1972_p13, %p1966_p6 }
  0x2f   : > { %1976 = shalt.err (!%p1973_p3)
}
  0x30   : > { %s2080_s26 = smov [#allocation8]   ;;  %s1567_s28 = sshll.u32 %s205_s23, 6 }
  0x31   : > { %1894 = dma.vmem_to_smem (!%p2190_p7), %s189_s14, 16, %s2080_s26, [#allocation9]  }
  0x32   : > { %s1700_s8 = sshll.u32 %s2077_s21, 10  ;;  %s209_s13 = scalar_lea.vmem [#allocation3], %s1567_s28 }
  0x33   : > { %s2220_s12 = scalar_lea.hbm %s2691_s0, %s1700_s8  ;;  %s216_s16 = sshll.u32 %s209_s13, 4  ;;  %s2222_s16 = int_to_ptr.vmem [resolvable:$true] %s216_s16 }
  0x34   : > { %s2224_s17 = scalar_lea.sflag [#allocation4], %s205_s23  ;;  %s1977_s11 = scalar_lea.hbm %s2220_s12, 1024 }
  0x35   : > { %p1978_p4 = scmp.ne.s32.totalorder %s2220_s12, %s1977_s11  ;;  %p2709_p6 = scmp.ne.s32.totalorder %s2708_s15, 0 }
  0x36   : > { %s1982_s26 = scalar_lea.hbm %s2691_s0, 2048  ;;  %p1983_p0 = scmp.lt.s32.totalorder %s2220_s12, %s2691_s0 }
  0x37   : > { %p1979_p11 = pneg %p2709_p6  ;;  %p1984_p7 = scmp.lt.s32.totalorder %s1982_s26, %s1977_s11 }
  0x39   : > { %p1980_p12 = pnand %p1979_p11, %p1978_p4  ;;  %p1985_p3 = por %p1984_p7, %p1983_p0 }
  0x3b   : > { %p1981_p13 = pneg %p1980_p12 }
  0x3d   : > { %p1986_p9 = pnand %p1985_p3, %p1981_p13 }
  0x3f   : > { %1989 = shalt.err (!%p1986_p9)
}
  0x40   : > { %s1990_s23 = scalar_lea.vmem %s2222_s16, 1024  ;;  %s2081_s28 = smov [#allocation3]  }
  0x41   : > { %p1991_p1 = scmp.ne.s32.totalorder %s2222_s16, %s1990_s23  ;;  %s1995_s10 = sshll.u32 %s2081_s28, 4  ;;  %s1996_s10 = int_to_ptr.vmem [resolvable:$false] %s1995_s10 }
  0x42   : > { %s1997_s13 = scalar_lea.vmem %s1996_s10, 2048  ;;  %p1998_p8 = scmp.lt.s32.totalorder %s2222_s16, %s1996_s10 }
  0x43   : > { %p1993_p5 = pnand %p1991_p1, %p1979_p11  ;;  %p1999_p10 = scmp.lt.s32.totalorder %s1997_s13, %s1990_s23 }
  0x45   : > { %p1994_p2 = pneg %p1993_p5  ;;  %p2000_p4 = por %p1999_p10, %p1998_p8 }
  0x47   : > { %p2001_p12 = pnand %p2000_p4, %p1994_p2 }
  0x49   : > { %2004 = shalt.err (!%p2001_p12)
}
  0x4a   : > { %s2082_s11 = smov 128   ;;  %s2083_s14 = smov 8  }
  0x4b   : > { %1898 = dma.hbm_to_vmem [thread:$0]  (!%p2709_p6), %s2220_s12, 1024, %s2222_s16, %s2224_s17, %s2082_s11, %s2082_s11, %s2083_s14  }
  0x4c   : > { %p2710_p11 = scmp.ne.s32.totalorder %s2706_s7, 0 }
  0x4d   : > { %s2248_s25 = sand.u32 (!%p2710_p11), 1, %s2069_s19   ;;  %p2711_p13 = scmp.ne.s32.totalorder (!%p2710_p11), %s2703_s29, 0 }
  0x4e   : > { %228 = sbr.rel (%p2710_p11) target bundleno = 572 (0x23c), region = 40  ;;  %s1571_s26 = sshll.u32 (!%p2710_p11), %s2248_s25, 6 }
  0x4f   : > { %s231_s8 = scalar_lea.sflag (!%p2710_p11), [#allocation4], %s2248_s25  ;;  %s234_s9 = scalar_lea.vmem (!%p2710_p11), [#allocation3], %s1571_s26 }
  0x53   : > { %2048 = dma.done.wait (%p2711_p13), %s231_s8, 1024  }
  0x54   : > { %2050 = vsyncadd (%p2711_p13), %s231_s8, 4294966272  ;;  %p2712_p0 = scmp.eq.s32.totalorder %s2138_s22, 0 }
  0x56   : > { %2052 = dma.done.wait (%p2712_p0), [#allocation6], 128   ;;  %p2713_p6 = pmov %p2712_p0 }
  0x57   : > { %p2714_p7 = pmov %p2712_p0 }
  0x58   : > { %2054 = vsyncadd (%p2713_p6), [#allocation6], 4294967168 }
  0x59   : > { %2056 = dma.done.wait (%p2714_p7), [#allocation9], 16   ;;  %p2715_p3 = pmov %p2712_p0 }
  0x5b   : > { %2058 = vsyncadd (%p2715_p3), [#allocation9], 4294967280 }
  0x5c   : > { %247 = sfence }
  0x5d   : > { %v271_v0 = vld [vmem:[%s2694_s3 + $0x8] sm:$0xff]  ;;  %v270_v1 = vld [vmem:[%s2694_s3] sm:$0xff]  ;;  %s287_s16 = sld [smem:[#allocation7]]  ;;  %v2276_v4 = vld [vmem:[%s234_s9 + $0x10] sm:$0xff]  ;;  %vm313_vm0 = vcmask 130048   ;;  %vm818_vm1 = vcmask 261120  }
  0x5e   : > { %1768 = vmatprep.subr.mxu0 %v271_v0  ;;  %s1581_s17 = sld [smem:[#allocation7 + $0x1]]  ;;  %v2270_v2 = vld [vmem:[%s234_s9] sm:$0xff]  ;;  %v2272_v3 = vld [vmem:[%s234_s9 + $0x8] sm:$0xff]  ;;  %v2278_v5 = vld [vmem:[%s234_s9 + $0x18] sm:$0xff]  ;;  %p2716_p1 = scmp.ne.s32.totalorder %s2704_s30, 0 }
  0x5f   : > { %1769 = vmatpush3.msra.mxu0 %v271_v0  ;;  %s1582_s23 = sld [smem:[#allocation7 + $0x2]]  ;;  %v2282_v6 = vld [vmem:[%s234_s9 + $0x20] sm:$0xff]  ;;  %v2284_v7 = vld [vmem:[%s234_s9 + $0x28] sm:$0xff]  ;;  %v2288_v9 = vld [vmem:[%s234_s9 + $0x30] sm:$0xff] }
  0x60   : > { %1770 = vmatprep.subr.mxu0 %v270_v1  ;;  %s1583_s28 = sld [smem:[#allocation7 + $0x3]]  ;;  %v2290_v10 = vld [vmem:[%s234_s9 + $0x38] sm:$0xff] }
  0x61   : > { %1771 = vmatpush3.msra.mxu0 %v270_v1  ;;  %s2274_s10 = sld [smem:[#allocation8]] }
  0x62   : > { %s2280_s13 = sld [smem:[#allocation7 + $0x80]] }
  0x63   : > { %v288_v8 = vstv %s287_s16  ;;  %s2286_s11 = sld [smem:[#allocation7 + $0x81]] }
  0x64   : > { %v289_v11 = vmul.f32 %v288_v8, %v2270_v2  ;;  %v290_v12 = vmul.f32 %v288_v8, %v2272_v3  ;;  %v292_v13 = vstv %s1581_s17  ;;  %s2294_s14 = sld [smem:[#allocation7 + $0x82]] }
  0x65   : > { %v293_v14 = vmul.f32 %v2276_v4, %v292_v13  ;;  %v294_v15 = vmul.f32 %v2278_v5, %v292_v13  ;;  %v298_v16 = vstv %s1582_s23  ;;  %s2298_s26 = sld [smem:[#allocation7 + $0x83]] }
  0x66   : > { %v299_v17 = vmul.f32 %v2282_v6, %v298_v16  ;;  %v300_v18 = vmul.f32 %v2284_v7, %v298_v16  ;;  %v304_v19 = vstv %s1583_s28  ;;  %s2302_s8 = sld [smem:[#allocation8 + $0x1]] }
  0x67   : > { %v295_v20 = vadd.f32 %v293_v14, %v289_v11  ;;  %v296_v21 = vadd.f32 %v294_v15, %v290_v12  ;;  %v305_v22 = vmul.f32 %v2288_v9, %v304_v19  ;;  %v306_v23 = vmul.f32 %v2290_v10, %v304_v19  ;;  %s2306_s9 = sld [smem:[#allocation7 + $0x100]] }
  0x68   : > { %v310_v24 = vstv %s2274_s10  ;;  %v317_v25 = vstv %s2280_s13  ;;  %s2310_s7 = sld [smem:[#allocation7 + $0x101]] }
  0x69   : > { %v301_v26 = vadd.f32 %v299_v17, %v295_v20  ;;  %v302_v27 = vadd.f32 %v300_v18, %v296_v21  ;;  %v318_v28 = vmul.f32 %v317_v25, %v2270_v2  ;;  %v321_v29 = vstv %s2286_s11  ;;  %s2314_s15 = sld [smem:[#allocation7 + $0x102]] }
  0x6a   : > { %v322_v30 = vmul.f32 %v2276_v4, %v321_v29  ;;  %v327_v31 = vstv %s2294_s14  ;;  %v319_v32 = vmul.f32 %v317_v25, %v2272_v3  ;;  %v323_v33 = vmul.f32 %v2278_v5, %v321_v29  ;;  %s2320_s12 = sld [smem:[#allocation7 + $0x103]] }
  0x6b   : > { %v307_v34 = vadd.f32 %v305_v22, %v301_v26  ;;  %v308_v35 = vadd.f32 %v306_v23, %v302_v27  ;;  %v328_v36 = vmul.f32 %v2282_v6, %v327_v31  ;;  %v333_v37 = vstv %s2298_s26  ;;  %s2324_s29 = sld [smem:[#allocation8 + $0x2]] }
  0x6c   : > { %v324_v38 = vadd.f32 %v322_v30, %v318_v28  ;;  %v334_v39 = vmul.f32 %v2288_v9, %v333_v37  ;;  %v325_v40 = vadd.f32 %v323_v33, %v319_v32  ;;  %s2327_s16 = sld [smem:[#allocation7 + $0x180]]  ;;  %v329_v43 = vmul.f32 %v2284_v7, %v327_v31 }
  0x6d   : > { %v311_v41 = vadd.f32 %v310_v24, %v307_v34  ;;  %v312_v42 = vadd.f32 %v310_v24, %v308_v35  ;;  %v335_v44 = vmul.f32 %v2290_v10, %v333_v37  ;;  %s2331_s17 = sld [smem:[#allocation7 + $0x181]]  ;;  %v339_v46 = vstv %s2302_s8 }
  0x6e   : > { %v330_v45 = vadd.f32 %v328_v36, %v324_v38  ;;  %v345_v47 = vstv %s2306_s9  ;;  %v349_v48 = vstv %s2310_s7  ;;  %s2336_s23 = sld [smem:[#allocation7 + $0x182]]  ;;  %v331_v49 = vadd.f32 %v329_v43, %v325_v40 }
  0x6f   : > { %314 = vst.msk [vmem:[#allocation2] sm:$0xff] %vm313_vm0, %v311_v41  ;;  %315 = vst.msk [vmem:[#allocation2 + $0x8] sm:$0xff] %vm313_vm0, %v312_v42  ;;  %v346_v50 = vmul.f32 %v345_v47, %v2270_v2  ;;  %v350_v51 = vmul.f32 %v2276_v4, %v349_v48  ;;  %v355_v52 = vstv %s2314_s15  ;;  %s2343_s28 = sld [smem:[#allocation7 + $0x183]]  ;;  %v347_v56 = vmul.f32 %v345_v47, %v2272_v3 }
  0x70   : > { %v336_v53 = vadd.f32 %v334_v39, %v330_v45  ;;  %v356_v54 = vmul.f32 %v2282_v6, %v355_v52  ;;  %v361_v55 = vstv %s2320_s12  ;;  %s2348_s10 = sld [smem:[#allocation8 + $0x3]]  ;;  %v337_v57 = vadd.f32 %v335_v44, %v331_v49 }
  0x71   : > { %v352_v58 = vadd.f32 %v350_v51, %v346_v50  ;;  %v362_v59 = vmul.f32 %v2288_v9, %v361_v55  ;;  %v367_v60 = vstv %s2324_s29  ;;  %s2352_s13 = sld [smem:[#allocation7 + $0x200]]  ;;  %v351_v62 = vmul.f32 %v2278_v5, %v349_v48 }
  0x72   : > { %v340_v61 = vadd.f32 %v339_v46, %v336_v53  ;;  %v357_v63 = vmul.f32 %v2284_v7, %v355_v52  ;;  %v363_v0 = vmul.f32 %v2290_v10, %v361_v55  ;;  %s2357_s11 = sld [smem:[#allocation7 + $0x201]]  ;;  %v341_v1 = vadd.f32 %v339_v46, %v337_v57 }
  0x73   : > { %v358_v8 = vadd.f32 %v356_v54, %v352_v58  ;;  %v373_v11 = vstv %s2327_s16  ;;  %v377_v12 = vstv %s2331_s17  ;;  %s2361_s14 = sld [smem:[#allocation7 + $0x202]]  ;;  %v353_v13 = vadd.f32 %v351_v62, %v347_v56 }
  0x74   : > { %342 = vst.msk [vmem:[#allocation2 + $0x10] sm:$0xff] %vm313_vm0, %v340_v61  ;;  %v374_v14 = vmul.f32 %v373_v11, %v2270_v2  ;;  %v378_v15 = vmul.f32 %v2276_v4, %v377_v12  ;;  %v383_v16 = vstv %s2336_s23  ;;  %s2367_s26 = sld [smem:[#allocation7 + $0x203]]  ;;  %343 = vst.msk [vmem:[#allocation2 + $0x18] sm:$0xff] %vm313_vm0, %v341_v1  ;;  %v375_v20 = vmul.f32 %v373_v11, %v2272_v3 }
  0x75   : > { %v364_v17 = vadd.f32 %v362_v59, %v358_v8  ;;  %v384_v18 = vmul.f32 %v2282_v6, %v383_v16  ;;  %v389_v19 = vstv %s2343_s28  ;;  %s2373_s8 = sld [smem:[#allocation8 + $0x4]]  ;;  %v359_v23 = vadd.f32 %v357_v63, %v353_v13 }
  0x76   : > { %v512_v21 = vld [vmem:[#allocation2] sm:$0xff]  ;;  %v513_v22 = vld [vmem:[#allocation2 + $0x8] sm:$0xff]  ;;  %v380_v24 = vadd.f32 %v378_v15, %v374_v14  ;;  %v390_v25 = vmul.f32 %v2288_v9, %v389_v19  ;;  %v395_v26 = vstv %s2348_s10  ;;  %s2377_s9 = sld [smem:[#allocation7 + $0x280]]  ;;  %v379_v28 = vmul.f32 %v2278_v5, %v377_v12 }
  0x77   : > { %1772 = vmatprep.mubr.msk.f32.mxu0 %vm313_vm0, %v512_v21  ;;  %v368_v27 = vadd.f32 %v367_v60, %v364_v17  ;;  %v385_v29 = vmul.f32 %v2284_v7, %v383_v16  ;;  %v391_v30 = vmul.f32 %v2290_v10, %v389_v19  ;;  %s2383_s7 = sld [smem:[#allocation7 + $0x281]]  ;;  %v365_v31 = vadd.f32 %v363_v0, %v359_v23 }
  0x78   : > { %1773 = vmatmul.mubr.msk.f32.vlgmr.msra.gmra.mxu0 %vm313_vm0, %v513_v22  ;;  %v386_v32 = vadd.f32 %v384_v18, %v380_v24  ;;  %v401_v33 = vstv %s2352_s13  ;;  %v405_v34 = vstv %s2357_s11  ;;  %s2388_s15 = sld [smem:[#allocation7 + $0x282]]  ;;  %v381_v35 = vadd.f32 %v379_v28, %v375_v20 }
  0x79   : > { %370 = vst.msk [vmem:[#allocation2 + $0x20] sm:$0xff] %vm313_vm0, %v368_v27  ;;  %v402_v36 = vmul.f32 %v401_v33, %v2270_v2  ;;  %v406_v37 = vmul.f32 %v2276_v4, %v405_v34  ;;  %v411_v38 = vstv %s2361_s14  ;;  %s2394_s12 = sld [smem:[#allocation7 + $0x283]]  ;;  %v369_v39 = vadd.f32 %v367_v60, %v365_v31 }
  0x7a   : > { %v392_v40 = vadd.f32 %v390_v25, %v386_v32  ;;  %v412_v41 = vmul.f32 %v2282_v6, %v411_v38  ;;  %v417_v42 = vstv %s2367_s26  ;;  %s2398_s29 = sld [smem:[#allocation8 + $0x5]]  ;;  %v387_v44 = vadd.f32 %v385_v29, %v381_v35 }
  0x7b   : > { %v514_v43 = vld [vmem:[#allocation2 + $0x10] sm:$0xff]  ;;  %v408_v45 = vadd.f32 %v406_v37, %v402_v36  ;;  %v418_v46 = vmul.f32 %v2288_v9, %v417_v42  ;;  %v423_v47 = vstv %s2373_s8  ;;  %s2402_s16 = sld [smem:[#allocation7 + $0x300]]  ;;  %v515_v48 = vld [vmem:[#allocation2 + $0x18] sm:$0xff]  ;;  %371 = vst.msk [vmem:[#allocation2 + $0x28] sm:$0xff] %vm313_vm0, %v369_v39  ;;  %v403_v50 = vmul.f32 %v401_v33, %v2272_v3 }
  0x7c   : > { %1775 = vmatprep.mubr.msk.f32.mxu0 %vm313_vm0, %v514_v43  ;;  %v396_v49 = vadd.f32 %v395_v26, %v392_v40  ;;  %v407_v51 = vmul.f32 %v2278_v5, %v405_v34  ;;  %v413_v52 = vmul.f32 %v2284_v7, %v411_v38  ;;  %s2409_s17 = sld [smem:[#allocation7 + $0x301]]  ;;  %v393_v53 = vadd.f32 %v391_v30, %v387_v44 }
  0x7d   : > { %1776 = vmatmul.mubr.msk.f32.gmra.mxu0 %vm313_vm0, %v515_v48  ;;  %v414_v54 = vadd.f32 %v412_v41, %v408_v45  ;;  %v419_v55 = vmul.f32 %v2290_v10, %v417_v42  ;;  %v429_v56 = vstv %s2377_s9  ;;  %s2414_s23 = sld [smem:[#allocation7 + $0x302]]  ;;  %v433_v59 = vstv %s2383_s7  ;;  %s2084_s7 = smov [#allocation10]  }
  0x7e   : > { %398 = vst.msk [vmem:[#allocation2 + $0x30] sm:$0xff] %vm313_vm0, %v396_v49  ;;  %v409_v57 = vadd.f32 %v407_v51, %v403_v50  ;;  %v430_v58 = vmul.f32 %v429_v56, %v2270_v2  ;;  %v439_v60 = vstv %s2388_s15  ;;  %s2420_s28 = sld [smem:[#allocation7 + $0x303]]  ;;  %v397_v61 = vadd.f32 %v395_v26, %v393_v53  ;;  %s2009_s15 = sshll.u32 %s2084_s7, 4  ;;  %s2010_s15 = int_to_ptr.vmem [resolvable:$false] %s2009_s15 }
  0x7f   : > { %v420_v62 = vadd.f32 %v418_v46, %v414_v54  ;;  %v434_v63 = vmul.f32 %v2276_v4, %v433_v59  ;;  %v440_v0 = vmul.f32 %v2282_v6, %v439_v60  ;;  %s2424_s10 = sld [smem:[#allocation8 + $0x6]]  ;;  %v445_v11 = vstv %s2394_s12  ;;  %s2011_s12 = scalar_lea.vmem %s2010_s15, 8192 }
  0x80   : > { %v516_v1 = vld [vmem:[#allocation2 + $0x20] sm:$0xff]  ;;  %v415_v8 = vadd.f32 %v413_v52, %v409_v57  ;;  %v451_v12 = vstv %s2398_s29  ;;  %v431_v13 = vmul.f32 %v429_v56, %v2272_v3  ;;  %s2429_s13 = sld [smem:[#allocation7 + $0x380]]  ;;  %399 = vst.msk [vmem:[#allocation2 + $0x38] sm:$0xff] %vm313_vm0, %v397_v61  ;;  %v446_v16 = vmul.f32 %v2288_v9, %v445_v11 }
  0x81   : > { %1778 = vmatprep.mubr.msk.f32.mxu0 %vm313_vm0, %v516_v1  ;;  %v424_v14 = vadd.f32 %v423_v47, %v420_v62  ;;  %v436_v15 = vadd.f32 %v434_v63, %v430_v58  ;;  %v435_v17 = vmul.f32 %v2278_v5, %v433_v59  ;;  %s2435_s11 = sld [smem:[#allocation7 + $0x381]]  ;;  %v441_v19 = vmul.f32 %v2284_v7, %v439_v60 }
  0x82   : > { %v421_v18 = vadd.f32 %v419_v55, %v415_v8  ;;  %v447_v20 = vmul.f32 %v2290_v10, %v445_v11  ;;  %v457_v21 = vstv %s2402_s16  ;;  %s2440_s14 = sld [smem:[#allocation7 + $0x382]]  ;;  %v517_v22 = vld [vmem:[#allocation2 + $0x28] sm:$0xff]  ;;  %v461_v26 = vstv %s2409_s17 }
  0x83   : > { %426 = vst.msk [vmem:[#allocation2 + $0x40] sm:$0xff] %vm313_vm0, %v424_v14  ;;  %v442_v23 = vadd.f32 %v440_v0, %v436_v15  ;;  %v437_v24 = vadd.f32 %v435_v17, %v431_v13  ;;  %v458_v25 = vmul.f32 %v457_v21, %v2270_v2  ;;  %s2445_s26 = sld [smem:[#allocation7 + $0x383]]  ;;  %1779 = vmatmul.mubr.msk.f32.gmra.mxu0 %vm313_vm0, %v517_v22  ;;  %v467_v29 = vstv %s2414_s23  ;;  %v2507_v22 = vld [vmem:[%s2695_s4 + $0x10] sm:$0xff] }
  0x84   : > { %v425_v27 = vadd.f32 %v423_v47, %v421_v18  ;;  %v462_v28 = vmul.f32 %v2276_v4, %v461_v26  ;;  %v473_v30 = vstv %s2420_s28  ;;  %v468_v34 = vmul.f32 %v2282_v6, %v467_v29  ;;  %s2458_s8 = sld [smem:[#allocation8 + $0x7]]  ;;  %v2493_v18 = vld [vmem:[%s2695_s4] sm:$0xff]  ;;  %s1574_s28 = sshll.u32 %s2248_s25, 8 }
  0x85   : > { %v518_v31 = vld [vmem:[#allocation2 + $0x30] sm:$0xff]  ;;  %v448_v32 = vadd.f32 %v446_v16, %v442_v23  ;;  %v443_v33 = vadd.f32 %v441_v19, %v437_v24  ;;  %v474_v35 = vmul.f32 %v2288_v9, %v473_v30  ;;  %v479_v37 = vstv %s2424_s10  ;;  %1800 = vmatprep.mubr.msk.f32.mxu1 %vm313_vm0, %v2493_v18  ;;  %s2575_s10 = scalar_lea.vmem [#allocation10], %s1574_s28 }
  0x86   : > { %1781 = vmatprep.mubr.msk.f32.mxu0 %vm313_vm0, %v518_v31  ;;  %427 = vst.msk [vmem:[#allocation2 + $0x48] sm:$0xff] %vm313_vm0, %v425_v27  ;;  %v464_v36 = vadd.f32 %v462_v28, %v458_v25  ;;  %v459_v38 = vmul.f32 %v457_v21, %v2272_v3  ;;  %v463_v39 = vmul.f32 %v2278_v5, %v461_v26  ;;  %v485_v47 = vstv %s2429_s13  ;;  %v2502_v21 = vld [vmem:[%s2695_s4 + $0x8] sm:$0xff]  ;;  %v2516_v25 = vld [vmem:[%s2695_s4 + $0x18] sm:$0xff]  ;;  %s1701_s13 = sshll.u32 %s2138_s22, 12  ;;  %s1454_s22 = scalar_lea.sflag [#allocation5], %s2248_s25 }
  0x87   : > { %v452_v40 = vadd.f32 %v451_v12, %v448_v32  ;;  %v449_v41 = vadd.f32 %v447_v20, %v443_v33  ;;  %v469_v42 = vmul.f32 %v2284_v7, %v467_v29  ;;  %v475_v43 = vmul.f32 %v2290_v10, %v473_v30  ;;  %v519_v44 = vld [vmem:[#allocation2 + $0x38] sm:$0xff] }
  0x88   : > { %v470_v45 = vadd.f32 %v468_v34, %v464_v36  ;;  %v465_v46 = vadd.f32 %v463_v39, %v459_v38  ;;  %v489_v48 = vstv %s2435_s11  ;;  %1782 = vmatmul.mubr.msk.f32.gmra.mxu0 %vm313_vm0, %v519_v44  ;;  %v486_v50 = vmul.f32 %v485_v47, %v2270_v2  ;;  %s1467_s11 = sshll.u32 %s2575_s10, 4  ;;  %s2644_s11 = int_to_ptr.vmem [resolvable:$true] %s1467_s11 }
  0x89   : > { %454 = vst.msk [vmem:[#allocation2 + $0x50] sm:$0xff] %vm313_vm0, %v452_v40  ;;  %v453_v49 = vadd.f32 %v451_v12, %v449_v41  ;;  %v490_v51 = vmul.f32 %v2276_v4, %v489_v48  ;;  %v495_v52 = vstv %s2440_s14  ;;  %v501_v57 = vstv %s2445_s26  ;;  %s2005_s9 = scalar_lea.vmem %s2644_s11, 4096  ;;  %p2012_p8 = scmp.lt.s32.totalorder %s2644_s11, %s2010_s15 }
  0x8a   : > { %v520_v53 = vld [vmem:[#allocation2 + $0x40] sm:$0xff]  ;;  %v476_v54 = vadd.f32 %v474_v35, %v470_v45  ;;  %v471_v55 = vadd.f32 %v469_v42, %v465_v46  ;;  %v496_v56 = vmul.f32 %v2282_v6, %v495_v52  ;;  %v502_v59 = vmul.f32 %v2288_v9, %v501_v57  ;;  %p2006_p9 = scmp.ne.s32.totalorder %s2644_s11, %s2005_s9  ;;  %p2013_p10 = scmp.lt.s32.totalorder %s2011_s12, %s2005_s9 }
  0x8b   : > { %1784 = vmatprep.mubr.msk.f32.mxu0 %vm313_vm0, %v520_v53  ;;  %455 = vst.msk [vmem:[#allocation2 + $0x58] sm:$0xff] %vm313_vm0, %v453_v49  ;;  %v492_v58 = vadd.f32 %v490_v51, %v486_v50  ;;  %v487_v60 = vmul.f32 %v485_v47, %v2272_v3  ;;  %v491_v4 = vmul.f32 %v2278_v5, %v489_v48  ;;  %v507_v1 = vstv %s2458_s8  ;;  %s2642_s8 = scalar_lea.hbm %s2696_s5, %s1701_s13 }
  0x8c   : > { %v480_v2 = vadd.f32 %v479_v37, %v476_v54  ;;  %v477_v61 = vadd.f32 %v475_v43, %v471_v55  ;;  %v497_v62 = vmul.f32 %v2284_v7, %v495_v52  ;;  %v503_v11 = vmul.f32 %v2290_v10, %v501_v57  ;;  %p2007_p5 = pnand %p2006_p9, %p2716_p1  ;;  %p2014_p4 = por %p2013_p10, %p2012_p8 }
  0x8d   : > { %v521_v63 = vld [vmem:[#allocation2 + $0x48] sm:$0xff]  ;;  %v498_v0 = vadd.f32 %v496_v56, %v492_v58  ;;  %v493_v8 = vadd.f32 %v491_v4, %v487_v60 }
  0x8e   : > { %1785 = vmatmul.mubr.msk.f32.gmra.mxu0 %vm313_vm0, %v521_v63  ;;  %482 = vst.msk [vmem:[#allocation2 + $0x60] sm:$0xff] %vm313_vm0, %v480_v2  ;;  %v481_v6 = vadd.f32 %v479_v37, %v477_v61  ;;  %p2008_p2 = pneg %p2007_p5 }
  0x8f   : > { %v504_v9 = vadd.f32 %v502_v59, %v498_v0  ;;  %v499_v3 = vadd.f32 %v497_v62, %v493_v8 }
  0x90   : > { %v522_v12 = vld [vmem:[#allocation2 + $0x50] sm:$0xff]  ;;  %483 = vst.msk [vmem:[#allocation2 + $0x68] sm:$0xff] %vm313_vm0, %v481_v6  ;;  %p2015_p12 = pnand %p2014_p4, %p2008_p2 }
  0x91   : > { %1787 = vmatprep.mubr.msk.f32.mxu0 %vm313_vm0, %v522_v12  ;;  %v508_v5 = vadd.f32 %v507_v1, %v504_v9  ;;  %v505_v13 = vadd.f32 %v503_v11, %v499_v3 }
  0x92   : > { %v523_v7 = vld [vmem:[#allocation2 + $0x58] sm:$0xff] }
  0x93   : > { %1788 = vmatmul.mubr.msk.f32.gmra.mxu0 %vm313_vm0, %v523_v7  ;;  %510 = vst.msk [vmem:[#allocation2 + $0x70] sm:$0xff] %vm313_vm0, %v508_v5  ;;  %v509_v14 = vadd.f32 %v507_v1, %v505_v13 }
  0x95   : > { %v524_v15 = vld [vmem:[#allocation2 + $0x60] sm:$0xff]  ;;  %511 = vst.msk [vmem:[#allocation2 + $0x78] sm:$0xff] %vm313_vm0, %v509_v14 }
  0x96   : > { %1790 = vmatprep.mubr.msk.f32.mxu0 %vm313_vm0, %v524_v15 }
  0x97   : > { %v525_v10 = vld [vmem:[#allocation2 + $0x68] sm:$0xff] }
  0x98   : > { %1791 = vmatmul.mubr.msk.f32.gmra.mxu0 %vm313_vm0, %v525_v10 }
  0x9a   : > { %v526_v16 = vld [vmem:[#allocation2 + $0x70] sm:$0xff] }
  0x9b   : > { %1793 = vmatprep.mubr.msk.f32.mxu0 %vm313_vm0, %v526_v16 }
  0x9c   : > { %v527_v17 = vld [vmem:[#allocation2 + $0x78] sm:$0xff] }
  0x9d   : > { %1794 = vmatmul.mubr.msk.f32.gmra.mxu0 %vm313_vm0, %v527_v17 }
  0x9e   : > { %1840 = vmatprep.mubr.msk.f32.mxu0 %vm313_vm0, %v2493_v18 }
 0x138   : > { %v1774_v19 = vpop.f32.mrf.mxu0 }
 0x139   : > { %1796 = vmatprep.subr.mxu1 %v1774_v19 }
 0x13a   : > { %v642_v20 = vpop.f32.mrf.mxu0  ;;  %1797 = vmatpush3.msra.mxu1 %v1774_v19 }
 0x13b   : > { %1798 = vmatprep.subr.mxu1 %v642_v20 }
 0x13c   : > { %1799 = vmatpush3.msra.mxu1 %v642_v20 }
 0x13d   : > { %v1777_v23 = vpop.f32.mrf.mxu0  ;;  %1801 = vmatmul.mubr.msk.f32.vlgmr.msra.gmra.mxu1 %vm313_vm0, %v2502_v21 }
 0x13e   : > { %1806 = vmatprep.subr.mxu1 %v1777_v23  ;;  %1803 = vmatprep.mubr.msk.f32.mxu1 %vm313_vm0, %v2507_v22 }
 0x13f   : > { %v652_v24 = vpop.f32.mrf.mxu0  ;;  %1807 = vmatpush3.msra.mxu1 %v1777_v23 }
 0x140   : > { %1808 = vmatprep.subr.mxu1 %v652_v24 }
 0x141   : > { %1809 = vmatpush3.msra.mxu1 %v652_v24 }
 0x142   : > { %1804 = vmatmul.mubr.msk.f32.gmra.mxu1 %vm313_vm0, %v2516_v25 }
 0x143   : > { %1810 = vmatprep.mubr.msk.f32.mxu1 %vm313_vm0, %v2493_v18  ;;  %v1780_v26 = vpop.f32.mrf.mxu0 }
 0x144   : > { %1816 = vmatprep.subr.mxu1 %v1780_v26 }
 0x145   : > { %v662_v27 = vpop.f32.mrf.mxu0 }
 0x146   : > { %1811 = vmatmul.mubr.msk.f32.vlgmr.msra.gmra.mxu1 %vm313_vm0, %v2502_v21 }
 0x147   : > { %1817 = vmatpush3.msra.mxu1 %v1780_v26  ;;  %1813 = vmatprep.mubr.msk.f32.mxu1 %vm313_vm0, %v2507_v22 }
 0x148   : > { %1818 = vmatprep.subr.mxu1 %v662_v27  ;;  %v1783_v28 = vpop.f32.mrf.mxu0 }
 0x149   : > { %1819 = vmatpush3.msra.mxu1 %v662_v27 }
 0x14a   : > { %1826 = vmatprep.subr.mxu1 %v1783_v28  ;;  %1814 = vmatmul.mubr.msk.f32.gmra.mxu1 %vm313_vm0, %v2516_v25  ;;  %v672_v29 = vpop.f32.mrf.mxu0 }
 0x14b   : > { %1820 = vmatprep.mubr.msk.f32.mxu1 %vm313_vm0, %v2493_v18 }
 0x14e   : > { %v1786_v30 = vpop.f32.mrf.mxu0  ;;  %1821 = vmatmul.mubr.msk.f32.vlgmr.msra.gmra.mxu1 %vm313_vm0, %v2502_v21 }
 0x14f   : > { %1836 = vmatprep.subr.mxu0 %v1786_v30  ;;  %1827 = vmatpush3.msra.mxu1 %v1783_v28 }
 0x150   : > { %v682_v31 = vpop.f32.mrf.mxu0  ;;  %1837 = vmatpush3.msra.mxu0 %v1786_v30  ;;  %1828 = vmatprep.subr.mxu1 %v672_v29 }
 0x151   : > { %1838 = vmatprep.subr.mxu0 %v682_v31  ;;  %1829 = vmatpush3.msra.mxu1 %v672_v29 }
 0x152   : > { %1839 = vmatpush3.msra.mxu0 %v682_v31  ;;  %1823 = vmatprep.mubr.msk.f32.mxu1 %vm313_vm0, %v2507_v22 }
 0x153   : > { %1824 = vmatmul.mubr.msk.f32.gmra.mxu1 %vm313_vm0, %v2516_v25  ;;  %v1789_v32 = vpop.f32.mrf.mxu0  ;;  %1841 = vmatmul.mubr.msk.f32.vlgmr.msra.gmra.mxu0 %vm313_vm0, %v2502_v21 }
 0x154   : > { %1830 = vmatprep.mubr.msk.f32.mxu1 %vm313_vm0, %v2493_v18  ;;  %1846 = vmatprep.subr.mxu1 %v1789_v32 }
 0x155   : > { %v692_v33 = vpop.f32.mrf.mxu0  ;;  %1843 = vmatprep.mubr.msk.f32.mxu0 %vm313_vm0, %v2507_v22 }
 0x157   : > { %1831 = vmatmul.mubr.msk.f32.vlgmr.msra.gmra.mxu1 %vm313_vm0, %v2502_v21  ;;  %1844 = vmatmul.mubr.msk.f32.gmra.mxu0 %vm313_vm0, %v2516_v25 }
 0x158   : > { %1847 = vmatpush3.msra.mxu1 %v1789_v32  ;;  %v1792_v34 = vpop.f32.mrf.mxu0  ;;  %1833 = vmatprep.mubr.msk.f32.mxu1 %vm313_vm0, %v2507_v22 }
 0x159   : > { %1848 = vmatprep.subr.mxu1 %v692_v33  ;;  %1856 = vmatprep.subr.mxu0 %v1792_v34 }
 0x15a   : > { %1849 = vmatpush3.msra.mxu1 %v692_v33  ;;  %v702_v35 = vpop.f32.mrf.mxu0  ;;  %1857 = vmatpush3.msra.mxu0 %v1792_v34 }
 0x15b   : > { %1834 = vmatmul.mubr.msk.f32.gmra.mxu1 %vm313_vm0, %v2516_v25  ;;  %1858 = vmatprep.subr.mxu0 %v702_v35 }
 0x15c   : > { %1859 = vmatpush3.msra.mxu0 %v702_v35  ;;  %1850 = vmatprep.mubr.msk.f32.mxu1 %vm313_vm0, %v2493_v18 }
 0x15d   : > { %1860 = vmatprep.mubr.msk.f32.mxu0 %vm313_vm0, %v2493_v18  ;;  %v1795_v36 = vpop.f32.mrf.mxu0 }
 0x15e   : > { %1861 = vmatmul.mubr.msk.f32.vlgmr.msra.gmra.mxu0 %vm313_vm0, %v2502_v21  ;;  %1866 = vmatprep.subr.mxu1 %v1795_v36 }
 0x15f   : > { %1851 = vmatmul.mubr.msk.f32.vlgmr.msra.gmra.mxu1 %vm313_vm0, %v2502_v21  ;;  %v712_v37 = vpop.f32.mrf.mxu0  ;;  %1863 = vmatprep.mubr.msk.f32.mxu0 %vm313_vm0, %v2507_v22 }
 0x160   : > { %1867 = vmatpush3.msra.mxu1 %v1795_v36  ;;  %1853 = vmatprep.mubr.msk.f32.mxu1 %vm313_vm0, %v2507_v22 }
 0x161   : > { %1868 = vmatprep.subr.mxu1 %v712_v37 }
 0x162   : > { %1869 = vmatpush3.msra.mxu1 %v712_v37  ;;  %1864 = vmatmul.mubr.msk.f32.gmra.mxu0 %vm313_vm0, %v2516_v25 }
 0x163   : > { %1854 = vmatmul.mubr.msk.f32.gmra.mxu1 %vm313_vm0, %v2516_v25 }
 0x164   : > { %1870 = vmatprep.mubr.msk.f32.mxu1 %vm313_vm0, %v2493_v18 }
 0x167   : > { %1871 = vmatmul.mubr.msk.f32.vlgmr.msra.gmra.mxu1 %vm313_vm0, %v2502_v21 }
 0x168   : > { %1873 = vmatprep.mubr.msk.f32.mxu1 %vm313_vm0, %v2507_v22 }
 0x16b   : > { %1874 = vmatmul.mubr.msk.f32.gmra.mxu1 %vm313_vm0, %v2516_v25 }
 0x1fd   : > { %v1802_v38 = vpop.f32.mrf.mxu1 }
 0x1fe   : > { %820 = vst.msk [vmem:[%s2575_s10 + $0x8] sm:$0xff] %vm818_vm1, %v1802_v38 }
 0x1ff   : > { %v799_v39 = vpop.f32.mrf.mxu1 }
 0x200   : > { %819 = vst.msk [vmem:[%s2575_s10] sm:$0xff] %vm818_vm1, %v799_v39 }
 0x202   : > { %v1805_v40 = vpop.f32.mrf.mxu1 }
 0x203   : > { %822 = vst.msk [vmem:[%s2575_s10 + $0x18] sm:$0xff] %vm818_vm1, %v1805_v40 }
 0x204   : > { %v809_v41 = vpop.f32.mrf.mxu1 }
 0x205   : > { %821 = vst.msk [vmem:[%s2575_s10 + $0x10] sm:$0xff] %vm818_vm1, %v809_v41 }
 0x206   : > { %v1812_v42 = vpop.f32.mrf.mxu1 }
 0x207   : > { %1644 = vst.msk [vmem:[%s2575_s10 + $0x28] sm:$0xff] %vm818_vm1, %v1812_v42 }
 0x208   : > { %v889_v43 = vpop.f32.mrf.mxu1 }
 0x209   : > { %1643 = vst.msk [vmem:[%s2575_s10 + $0x20] sm:$0xff] %vm818_vm1, %v889_v43 }
 0x20a   : > { %v1815_v44 = vpop.f32.mrf.mxu1 }
 0x20b   : > { %1646 = vst.msk [vmem:[%s2575_s10 + $0x38] sm:$0xff] %vm818_vm1, %v1815_v44 }
 0x20c   : > { %v899_v45 = vpop.f32.mrf.mxu1 }
 0x20d   : > { %1645 = vst.msk [vmem:[%s2575_s10 + $0x30] sm:$0xff] %vm818_vm1, %v899_v45 }
 0x20e   : > { %v1822_v46 = vpop.f32.mrf.mxu1 }
 0x20f   : > { %1652 = vst.msk [vmem:[%s2575_s10 + $0x48] sm:$0xff] %vm818_vm1, %v1822_v46 }
 0x210   : > { %v979_v47 = vpop.f32.mrf.mxu1 }
 0x211   : > { %1651 = vst.msk [vmem:[%s2575_s10 + $0x40] sm:$0xff] %vm818_vm1, %v979_v47 }
 0x213   : > { %v1825_v48 = vpop.f32.mrf.mxu1  ;;  %v1842_v49 = vpop.f32.mrf.mxu0 }
 0x214   : > { %1654 = vst.msk [vmem:[%s2575_s10 + $0x58] sm:$0xff] %vm818_vm1, %v1825_v48  ;;  %1668 = vst.msk [vmem:[%s2575_s10 + $0x88] sm:$0xff] %vm818_vm1, %v1842_v49 }
 0x215   : > { %v989_v50 = vpop.f32.mrf.mxu1  ;;  %v1159_v51 = vpop.f32.mrf.mxu0 }
 0x216   : > { %1653 = vst.msk [vmem:[%s2575_s10 + $0x50] sm:$0xff] %vm818_vm1, %v989_v50  ;;  %1667 = vst.msk [vmem:[%s2575_s10 + $0x80] sm:$0xff] %vm818_vm1, %v1159_v51 }
 0x217   : > { %v1832_v52 = vpop.f32.mrf.mxu1  ;;  %v1845_v53 = vpop.f32.mrf.mxu0 }
 0x218   : > { %1660 = vst.msk [vmem:[%s2575_s10 + $0x68] sm:$0xff] %vm818_vm1, %v1832_v52  ;;  %1670 = vst.msk [vmem:[%s2575_s10 + $0x98] sm:$0xff] %vm818_vm1, %v1845_v53 }
 0x219   : > { %v1069_v54 = vpop.f32.mrf.mxu1  ;;  %v1169_v55 = vpop.f32.mrf.mxu0 }
 0x21a   : > { %1659 = vst.msk [vmem:[%s2575_s10 + $0x60] sm:$0xff] %vm818_vm1, %v1069_v54  ;;  %1669 = vst.msk [vmem:[%s2575_s10 + $0x90] sm:$0xff] %vm818_vm1, %v1169_v55 }
 0x21b   : > { %v1835_v56 = vpop.f32.mrf.mxu1 }
 0x21c   : > { %1662 = vst.msk [vmem:[%s2575_s10 + $0x78] sm:$0xff] %vm818_vm1, %v1835_v56 }
 0x21d   : > { %v1079_v57 = vpop.f32.mrf.mxu1 }
 0x21e   : > { %1661 = vst.msk [vmem:[%s2575_s10 + $0x70] sm:$0xff] %vm818_vm1, %v1079_v57  ;;  %v1862_v58 = vpop.f32.mrf.mxu0 }
 0x21f   : > { %v1852_v59 = vpop.f32.mrf.mxu1  ;;  %1684 = vst.msk [vmem:[%s2575_s10 + $0xc8] sm:$0xff] %vm818_vm1, %v1862_v58 }
 0x220   : > { %1676 = vst.msk [vmem:[%s2575_s10 + $0xa8] sm:$0xff] %vm818_vm1, %v1852_v59  ;;  %v1339_v60 = vpop.f32.mrf.mxu0 }
 0x221   : > { %v1249_v2 = vpop.f32.mrf.mxu1  ;;  %1683 = vst.msk [vmem:[%s2575_s10 + $0xc0] sm:$0xff] %vm818_vm1, %v1339_v60 }
 0x222   : > { %1675 = vst.msk [vmem:[%s2575_s10 + $0xa0] sm:$0xff] %vm818_vm1, %v1249_v2  ;;  %v1865_v61 = vpop.f32.mrf.mxu0 }
 0x223   : > { %v1855_v4 = vpop.f32.mrf.mxu1  ;;  %1686 = vst.msk [vmem:[%s2575_s10 + $0xd8] sm:$0xff] %vm818_vm1, %v1865_v61 }
 0x224   : > { %1678 = vst.msk [vmem:[%s2575_s10 + $0xb8] sm:$0xff] %vm818_vm1, %v1855_v4  ;;  %v1349_v62 = vpop.f32.mrf.mxu0 }
 0x225   : > { %v1259_v63 = vpop.f32.mrf.mxu1  ;;  %1685 = vst.msk [vmem:[%s2575_s10 + $0xd0] sm:$0xff] %vm818_vm1, %v1349_v62 }
 0x226   : > { %1677 = vst.msk [vmem:[%s2575_s10 + $0xb0] sm:$0xff] %vm818_vm1, %v1259_v63 }
 0x227   : > { %v1872_v0 = vpop.f32.mrf.mxu1 }
 0x228   : > { %1692 = vst.msk [vmem:[%s2575_s10 + $0xe8] sm:$0xff] %vm818_vm1, %v1872_v0 }
 0x229   : > { %v1429_v6 = vpop.f32.mrf.mxu1 }
 0x22a   : > { %1691 = vst.msk [vmem:[%s2575_s10 + $0xe0] sm:$0xff] %vm818_vm1, %v1429_v6 }
 0x22b   : > { %v1875_v1 = vpop.f32.mrf.mxu1 }
 0x22c   : > { %1694 = vst.msk [vmem:[%s2575_s10 + $0xf8] sm:$0xff] %vm818_vm1, %v1875_v1 }
 0x22d   : > { %v1439_v8 = vpop.f32.mrf.mxu1 }
 0x22e   : > { %1693 = vst.msk [vmem:[%s2575_s10 + $0xf0] sm:$0xff] %vm818_vm1, %v1439_v8 }
 0x22f   : > { %2018 = shalt.err (!%p2015_p12)
}
 0x230   : > { %s2019_s29 = scalar_lea.hbm %s2642_s8, 4096  ;;  %s2023_s23 = scalar_lea.hbm %s2696_s5, 8192 }
 0x231   : > { %p2020_p11 = scmp.ne.s32.totalorder %s2642_s8, %s2019_s29  ;;  %p2024_p6 = scmp.lt.s32.totalorder %s2642_s8, %s2696_s5 }
 0x232   : > { %p2025_p7 = scmp.lt.s32.totalorder %s2023_s23, %s2019_s29 }
 0x233   : > { %p2021_p13 = pnand %p2020_p11, %p2716_p1 }
 0x234   : > { %p2026_p3 = por %p2025_p7, %p2024_p6 }
 0x235   : > { %p2022_p0 = pneg %p2021_p13 }
 0x237   : > { %p2027_p9 = pnand %p2026_p3, %p2022_p0 }
 0x239   : > { %2030 = shalt.err (!%p2027_p9)
}
 0x23a   : > { %s2085_s13 = smov 128   ;;  %s2086_s14 = smov 8  }
 0x23b   : > { %1886 = dma.vmem_to_hbm [thread:$0]  (%p2716_p1), %s2644_s11, 4096, %s2642_s8, %s1454_s22, %s2085_s13, %s2085_s13, %s2086_s14  }
 0x23c PF: > { %s1482_s26 = sand.u32 1, %s2065_s18   ;;  %p2717_p5 = scmp.ne.s32.totalorder %s2705_s6, 0 }
 0x23d   : > { %p2718_p2 = scmp.ge.s32.totalorder %s2077_s21, 2  ;;  %s1483_s9 = scalar_lea.sflag [#allocation5], %s1482_s26 }
 0x23f   : > { %p1900_p8 = pnand %p2718_p2, %p2717_p5 }
 0x241   : > { %p1901_p10 = pneg %p1900_p8 }
 0x243   : > { %2060 = dma.done.wait (%p1901_p10), %s1483_s9, 4096  }
 0x244   : > { %2062 = vsyncadd (%p1901_p10), %s1483_s9, 4294963200  ;;  %p20_p4 = scmp.ge.s32.totalorder %s2142_s24, 4   ;;  %s2719_s18 = smov %s2069_s19 }
 0x245   : > { %s2720_s19 = smov %s2073_s20  ;;  %s2721_s20 = smov %s2154_s27 }
 0x246   : > { %s2722_s21 = smov %s2142_s24  ;;  %22 = sbr.rel (!%p20_p4) target bundleno = 7 (0x7), region = 104 }
 0x24b   :  { %1488 = vsyncpa [#allocation4], 1 }
 0x24c   :  { %1490 = vsyncpa [#allocation4 + $0x1], 1 }
 0x24d   :  { %1491 = vsyncpa [#allocation5], 1 }
 0x24e   :  { %1493 = vsyncpa [#allocation5 + $0x1], 1 }
 0x24f   :  { %1494 = vsyncpa [#allocation6], 1 }
 0x250   :  { %1496 = vsyncpa [#allocation6 + $0x1], 1 }
 0x251   :  { %1497 = vsyncpa [#allocation9], 1 }

</bundles_post_ra>
